<compile_context>
chip_gen: v7x
topology: tpu7x:2x2x1
jax: 0.10.0
libtpu: 0.0.40
codegen_flags: <defaults>
</compile_context>

<pallas_src>
import jax
import jax.numpy as jnp
from jax.experimental import pallas as pl
from jax.experimental.pallas import tpu as pltpu


def _round_up(x, m):
    return ((x + m - 1) // m) * m


def mlp_rec_kernel(ids_ref, m_ref, b1_ref, w2_ref, b2_ref, o_ref):
    """One batch tile; batch on the lane axis.

      ids_ref : [2, TB]  int32 — row 0 = user ids, row 1 = item ids + num_users
      m_ref   : [H, V]   compute dtype — fused (embedding @ W1-half)^T columns,
                          user columns first, item columns after (V lane-padded)
      b1_ref  : [H, 1]   float32
      w2_ref  : [H, 1]   float32 (second-layer column)
      b2_ref  : [1, 1]   float32 scalar in SMEM
      o_ref   : [1, TB]  float32 lane-dense output row
    """
    cd = m_ref.dtype
    v = m_ref.shape[1]
    tb = ids_ref.shape[1]

    uid = ids_ref[0:1, :]                                    # [1, TB]
    iid = ids_ref[1:2, :]                                    # [1, TB] (pre-offset)

    # Fused Embedding + Linear(2E -> H): one two-hot selection matmul on the MXU
    # computes W1u @ u_emb + W1i @ i_emb in a single K=V accumulating dot.
    col = jax.lax.broadcasted_iota(jnp.int32, (v, tb), 0)
    two_hot = ((col == uid) | (col == iid)).astype(cd)       # [V, TB]

    h = jnp.dot(m_ref[...], two_hot, preferred_element_type=jnp.float32)
    h = jnp.maximum(h + b1_ref[...], 0.0)                    # [H, TB] float32

    # Linear(H -> 1): VPU multiply + sublane reduction (avoids an N=1 matmul).
    o = jnp.sum(h * w2_ref[...], axis=0, keepdims=True) + b2_ref[0, 0]
    o_ref[...] = o.astype(o_ref.dtype)


def mlp_rec_forward(user_id, item_id, params, *, block_b=512,
                    compute_dtype=jnp.bfloat16):
    """Pallas-backed forward of the PyTorch MLP recommender.

    block_b: requested batch-tile size (multiple of 128).  It is automatically
    shrunk so the grid has at least 2 steps when the batch is large enough
    (keeps both v7x TensorCores busy) and never exceeds the padded batch.
    """
    assert block_b % 128 == 0, "block_b must be a multiple of 128 (lane width)"

    user_table = params["user_emb"]
    item_table = params["item_emb"]
    w1, b1, w2, b2 = params["w1"], params["b1"], params["w2"], params["b2"]

    num_users, E = user_table.shape
    num_items, _ = item_table.shape
    H = w1.shape[1]

    B = user_id.shape[0]
    b_ceil = _round_up(B, 128)
    if b_ceil >= 256:
        # Ensure >= 2 grid steps so dimension_semantics=("parallel",) can shard the
        # grid across both v7x TensorCores and the software pipeline actually runs.
        block_b = min(block_b, _round_up(-(-B // 2), 128))
    block_b = min(block_b, b_ceil)
    num_blocks = -(-B // block_b)
    B_pad = num_blocks * block_b

    # ids packed into a single [2, B_pad] operand (one DMA per grid step instead of
    # two); item ids are pre-offset so the kernel builds one combined two-hot.
    # Padded lanes carry id 0 (valid columns) and are sliced off below.
    uid = user_id.astype(jnp.int32)
    iid = item_id.astype(jnp.int32) + num_users
    ids = jnp.stack([uid, iid], axis=0)
    ids = jnp.pad(ids, ((0, 0), (0, B_pad - B)))

    # Fold Embedding + first-Linear halves (exact in f32, cast once to compute dtype):
    #   M = [[user_emb @ W1[:E]]^T | [item_emb @ W1[E:]]^T]   -> [H, NU+NI]
    # Valid while H * vocab stays comfortably inside VMEM (true at this scale).
    # TODO(synk): for 100K+ vocabularies switch to a scalar-prefetch / manual-DMA row
    # gather (memory_space=pl.ANY + pltpu.make_async_copy) instead of a VMEM-resident M.
    mu = (user_table.astype(jnp.float32) @ w1[:E, :].astype(jnp.float32)).T   # [H, NU]
    mi = (item_table.astype(jnp.float32) @ w1[E:, :].astype(jnp.float32)).T   # [H, NI]
    V = num_users + num_items
    V_pad = _round_up(V, 128)
    m = jnp.pad(jnp.concatenate([mu, mi], axis=1), ((0, 0), (0, V_pad - V)))
    m = m.astype(compute_dtype)                                               # [H, V_pad]

    b1_col = b1.reshape(H, 1).astype(jnp.float32)   # [H, 1]
    w2_col = w2.reshape(H, 1).astype(jnp.float32)   # [H, 1]
    b2_s = b2.reshape(1, 1).astype(jnp.float32)     # [1, 1] -> SMEM

    ids_spec = pl.BlockSpec((2, block_b), lambda b: (0, b))
    out_spec = pl.BlockSpec((1, block_b), lambda b: (0, b))

    def invariant(shape):
        # Constant-index operands: fetched once, block index never changes.
        return pl.BlockSpec(shape, lambda b: (0, 0))

    out = pl.pallas_call(
        mlp_rec_kernel,
        out_shape=jax.ShapeDtypeStruct((1, B_pad), jnp.float32),
        grid_spec=pltpu.PrefetchScalarGridSpec(
            num_scalar_prefetch=0,
            grid=(num_blocks,),
            in_specs=[
                ids_spec,                          # packed ids      [2, B_pad]
                invariant((H, V_pad)),             # fused M         [H, V_pad]
                invariant((H, 1)),                 # b1
                invariant((H, 1)),                 # w2 column
                pl.BlockSpec(memory_space=pltpu.MemorySpace.SMEM),  # b2 scalar
            ],
            out_specs=out_spec,                    # lane-dense [1, B_pad]
        ),
        compiler_params=pltpu.CompilerParams(
            dimension_semantics=("parallel",),
        ),
    )(ids, m, b1_col, w2_col, b2_s)

    return out[0, :B].reshape(B, 1)


def init_params(key, embedding_size, hidden_size, num_users, num_items):
    """Deterministic synthetic parameters (shapes match the torch module)."""
    k = jax.random.split(key, 6)
    # nn.Embedding default init ~ N(0, 1)
    user_emb = jax.random.normal(k[0], (num_users, embedding_size), jnp.float32)
    item_emb = jax.random.normal(k[1], (num_items, embedding_size), jnp.float32)
    # nn.Linear default init: U(-1/sqrt(fan_in), 1/sqrt(fan_in))
    fan1 = embedding_size * 2
    lim1 = 1.0 / jnp.sqrt(jnp.float32(fan1))
    w1 = jax.random.uniform(k[2], (fan1, hidden_size), jnp.float32, -lim1, lim1)
    b1 = jax.random.uniform(k[3], (1, hidden_size), jnp.float32, -lim1, lim1)
    lim2 = 1.0 / jnp.sqrt(jnp.float32(hidden_size))
    w2 = jax.random.uniform(k[4], (hidden_size, 1), jnp.float32, -lim2, lim2)
    b2 = jax.random.uniform(k[5], (1, 1), jnp.float32, -lim2, lim2)
    return {"user_emb": user_emb, "item_emb": item_emb,
            "w1": w1, "b1": b1, "w2": w2, "b2": b2}


def reference_forward(user_id, item_id, params):
    u = jnp.take(params["user_emb"], user_id, axis=0)
    i = jnp.take(params["item_emb"], item_id, axis=0)
    x = jnp.concatenate([u, i], axis=1)
    h = jnp.maximum(x @ params["w1"] + params["b1"], 0.0)
    return h @ params["w2"] + params["b2"]


if __name__ == "__main__":
    embedding_size = 16
    hidden_size = 32
    num_users = 10
    num_items = 20

    key = jax.random.PRNGKey(0)
    pkey, ukey, ikey = jax.random.split(key, 3)
    params = init_params(pkey, embedding_size, hidden_size, num_users, num_items)

    # --- small batch (single grid step) ---------------------------------------
    batch = 8
    user_id = jax.random.randint(ukey, (batch,), 0, num_users, dtype=jnp.int32)
    item_id = jax.random.randint(ikey, (batch,), 0, num_items, dtype=jnp.int32)
    ref = reference_forward(user_id, item_id, params)

    # f32 operand path — tight check against the XLA reference.
    out_f32 = jax.block_until_ready(
        mlp_rec_forward(user_id, item_id, params, compute_dtype=jnp.float32))
    assert out_f32.shape == (batch, 1), out_f32.shape
    assert jnp.allclose(out_f32, ref, atol=1e-4, rtol=1e-4), (out_f32, ref)

    # bf16 operand path (default) — f32 accumulation, looser tolerance.
    out_bf16 = jax.block_until_ready(mlp_rec_forward(user_id, item_id, params))
    assert out_bf16.shape == (batch, 1), out_bf16.shape
    assert jnp.allclose(out_bf16, ref, atol=1e-1, rtol=1e-1), (out_bf16, ref)

    # --- larger batch (exercises >= 2 grid steps / both v7x TCs) ---------------
    batch2 = 300
    u2key, i2key = jax.random.split(jax.random.PRNGKey(1))
    user_id2 = jax.random.randint(u2key, (batch2,), 0, num_users, dtype=jnp.int32)
    item_id2 = jax.random.randint(i2key, (batch2,), 0, num_items, dtype=jnp.int32)
    ref2 = reference_forward(user_id2, item_id2, params)
    out2 = jax.block_until_ready(mlp_rec_forward(user_id2, item_id2, params))
    assert out2.shape == (batch2, 1), out2.shape
    assert jnp.allclose(out2, ref2, atol=1e-1, rtol=1e-1), (out2, ref2)

    print("KERNEL_OK")
</pallas_src>

<mosaic_0001>
module attributes {stable_mosaic.version = 11 : i64} {
  func.func @mlp_rec_kernel(%arg0: i32, %arg1: memref<2x128xi32, #tpu.memory_space<vmem>>, %arg2: memref<32x128xf32, #tpu.memory_space<vmem>>, %arg3: memref<32x1xf32, #tpu.memory_space<vmem>>, %arg4: memref<32x1xf32, #tpu.memory_space<vmem>>, %arg5: memref<1x1xf32, #tpu.memory_space<smem>>, %arg6: memref<1x128xf32, #tpu.memory_space<vmem>>) attributes {dimension_semantics = [#tpu.dimension_semantics<parallel>], iteration_bounds = array<i64: 1>, scalar_prefetch = 0 : i64, scratch_operands = 0 : i64, tpu.core_type = #tpu.core_type<tc>, window_params = [{transform_indices = @transform_0, window_bounds = array<i64: 2, 128>}, {pipeline_mode = #tpu.pipeline_mode<synchronous>, transform_indices = @transform_1, window_bounds = array<i64: 32, 128>}, {pipeline_mode = #tpu.pipeline_mode<synchronous>, transform_indices = @transform_2, window_bounds = array<i64: 32, 1>}, {pipeline_mode = #tpu.pipeline_mode<synchronous>, transform_indices = @transform_3, window_bounds = array<i64: 32, 1>}, {transform_indices = @transform_4, window_bounds = array<i64: 1, 1>}, {transform_indices = @transform_5, window_bounds = array<i64: 1, 128>}]} {
    %c0 = arith.constant 0 : index
    %c0_0 = arith.constant 0 : index
    %0 = vector.load %arg1[%c0, %c0_0] : memref<2x128xi32, #tpu.memory_space<vmem>>, vector<1x128xi32>
    %c1 = arith.constant 1 : index
    %c0_1 = arith.constant 0 : index
    %1 = vector.load %arg1[%c1, %c0_1] : memref<2x128xi32, #tpu.memory_space<vmem>>, vector<1x128xi32>
    %2 = tpu.iota {dimensions = array<i32: 0>} : vector<128x128xi32>
    %3 = vector.broadcast %0 : vector<1x128xi32> to vector<128x128xi32>
    %4 = arith.cmpi eq, %2, %3 : vector<128x128xi32>
    %5 = vector.broadcast %1 : vector<1x128xi32> to vector<128x128xi32>
    %6 = arith.cmpi eq, %2, %5 : vector<128x128xi32>
    %7 = arith.ori %4, %6 : vector<128x128xi1>
    %8 = arith.extui %7 : vector<128x128xi1> to vector<128x128xi32>
    %9 = arith.sitofp %8 : vector<128x128xi32> to vector<128x128xf32>
    %c0_2 = arith.constant 0 : index
    %c0_3 = arith.constant 0 : index
    %10 = vector.load %arg2[%c0_2, %c0_3] : memref<32x128xf32, #tpu.memory_space<vmem>>, vector<32x128xf32>
    %cst = arith.constant dense<0.000000e+00> : vector<32x128xf32>
    %11 = tpu.matmul %10, %9, %cst {dimension_numbers = #tpu.dot_dimension_numbers<[1], [0], [0], [1], [0, 0, 1, 1], [], []>} : vector<32x128xf32>, vector<128x128xf32>, vector<32x128xf32> -> vector<32x128xf32>
    %c0_4 = arith.constant 0 : index
    %c0_5 = arith.constant 0 : index
    %12 = vector.load %arg3[%c0_4, %c0_5] : memref<32x1xf32, #tpu.memory_space<vmem>>, vector<32x1xf32>
    %13 = vector.broadcast %12 : vector<32x1xf32> to vector<32x128xf32>
    %14 = arith.addf %11, %13 : vector<32x128xf32>
    %cst_6 = arith.constant 0.000000e+00 : f32
    %15 = vector.broadcast %cst_6 : f32 to vector<32x128xf32>
    %16 = arith.maximumf %14, %15 : vector<32x128xf32>
    %c0_7 = arith.constant 0 : index
    %c0_8 = arith.constant 0 : index
    %17 = vector.load %arg4[%c0_7, %c0_8] : memref<32x1xf32, #tpu.memory_space<vmem>>, vector<32x1xf32>
    %18 = vector.broadcast %17 : vector<32x1xf32> to vector<32x128xf32>
    %19 = arith.mulf %16, %18 : vector<32x128xf32>
    %cst_9 = arith.constant dense<0.000000e+00> : vector<128xf32>
    %20 = vector.multi_reduction <add>, %19, %cst_9 [0] : vector<32x128xf32> to vector<128xf32>
    %21 = vector.shape_cast %20 : vector<128xf32> to vector<1x128xf32>
    %c0_10 = arith.constant 0 : index
    %c0_11 = arith.constant 0 : index
    %22 = memref.load %arg5[%c0_10, %c0_11] : memref<1x1xf32, #tpu.memory_space<smem>>
    %23 = vector.broadcast %22 : f32 to vector<1x128xf32>
    %24 = arith.addf %21, %23 : vector<1x128xf32>
    %c0_12 = arith.constant 0 : index
    %c0_13 = arith.constant 0 : index
    %25 = vector.load %arg6[%c0_12, %c0_13] : memref<1x128xf32, #tpu.memory_space<vmem>>, vector<1x128xf32>
    tpu.vector_store %arg6[%c0_12, %c0_13], %24 {strides = array<i32>} : memref<1x128xf32, #tpu.memory_space<vmem>>, vector<1x128xf32>,
    return
  }
  func.func @transform_0(%arg0: i32) -> (i32, i32) {
    %c0_i32 = arith.constant 0 : i32
    %c0_i32_0 = arith.constant 0 : i32
    return %c0_i32, %arg0 : i32, i32
  }
  func.func @transform_1(%arg0: i32) -> (i32, i32) {
    %c0_i32 = arith.constant 0 : i32
    %c0_i32_0 = arith.constant 0 : i32
    %c0_i32_1 = arith.constant 0 : i32
    return %c0_i32, %c0_i32_0 : i32, i32
  }
  func.func @transform_2(%arg0: i32) -> (i32, i32) {
    %c0_i32 = arith.constant 0 : i32
    %c0_i32_0 = arith.constant 0 : i32
    %c0_i32_1 = arith.constant 0 : i32
    return %c0_i32, %c0_i32_0 : i32, i32
  }
  func.func @transform_3(%arg0: i32) -> (i32, i32) {
    %c0_i32 = arith.constant 0 : i32
    %c0_i32_0 = arith.constant 0 : i32
    %c0_i32_1 = arith.constant 0 : i32
    return %c0_i32, %c0_i32_0 : i32, i32
  }
  func.func @transform_4(%arg0: i32) -> (i32, i32) {
    %c0_i32 = arith.constant 0 : i32
    %c0_i32_0 = arith.constant 0 : i32
    %c0_i32_1 = arith.constant 0 : i32
    return %c0_i32, %c0_i32_0 : i32, i32
  }
  func.func @transform_5(%arg0: i32) -> (i32, i32) {
    %c0_i32 = arith.constant 0 : i32
    %c0_i32_0 = arith.constant 0 : i32
    return %c0_i32, %arg0 : i32, i32
  }
}

</mosaic_0001>

<bundles_post_ra>
// kernel: tpu_custom_call.1
= control target key start
LH: loop header
LB: loop body
LE: loop exit
PB: predicated region body
PF: predicated region fallthrough
CT: control target
= control target key end

     0   :  { %v24_v1 = vlaneseq  ;;  %v470_v8 = vmov 0   ;;  %s693_s0 = inlined_call_operand.vmem [shape: s32[2,128], index: 0, kind: input, shape index: {}]   ;;  %s694_s1 = inlined_call_operand.vmem [shape: f32[32,128], index: 1, kind: input, shape index: {}]   ;;  %s695_s2 = inlined_call_operand.vmem [shape: f32[32,1], index: 2, kind: input, shape index: {}]   ;;  %s696_s3 = inlined_call_operand.vmem [shape: f32[32,1], index: 3, kind: input, shape index: {}]   ;;  %s697_s4 = inlined_call_operand.<no memory space> [shape: f32[1,1], index: 4, kind: input, shape index: {}]   ;;  %s698_s5 = inlined_call_operand.hbm [shape: f32[1,128], index: 5, kind: output, shape index: {}]  }
   0x1   :  { %v506_v0 = vld [vmem:[%s693_s0] ss:$0 sm:$0xff]  ;;  %v511_v2 = vld [vmem:[%s693_s0 + $0x1] ss:$0 sm:$0xff]  ;;  %v131_v4 = vld [vmem:[%s694_s1 + $0x10] sm:$0xff]  ;;  %444 = vset.pattern.permute.xlu0 %v470_v8  ;;  %445 = vset.pattern.permute.xlu1 %v470_v8 }
   0x2   :  { %v129_v3 = vld [vmem:[%s694_s1] sm:$0xff]  ;;  %v519_v5 = vshrl.u32 %v24_v1, 7  ;;  %390 = vmatprep.mubr.f32.mxu1 %v131_v4  ;;  %v135_v7 = vld [vmem:[%s695_s2 + $0x10] sm:$0xff]  ;;  %v134_v14 = vld [vmem:[%s695_s2 + $0x8] sm:$0xff] }
   0x3   :  { %387 = vmatprep.mubr.f32.mxu0 %v129_v3  ;;  %v133_v6 = vld [vmem:[%s695_s2] sm:$0xff]  ;;  %149 = vperm.xlu1 %445, %v135_v7   ;;  %v136_v15 = vld [vmem:[%s695_s2 + $0x18] sm:$0xff] }
   0x4   :  { %v26_v9 = vadd.s32 8, %v519_v5  ;;  %vm45_vm0 = vcmp.eq.s32.totalorder %v519_v5, %v506_v0  ;;  %vm65_vm1 = vcmp.eq.s32.totalorder %v519_v5, %v511_v2  ;;  %v27_v10 = vadd.s32 16, %v519_v5  ;;  %139 = vperm.xlu0 %444, %v133_v6  }
   0x5   :  { %vm81_vm2 = vmor %vm45_vm0, %vm65_vm1  ;;  %v28_v11 = vadd.s32 24, %v519_v5  ;;  %v29_v12 = vadd.s32 32, %v519_v5  ;;  %v30_v13 = vadd.s32 40, %v519_v5 }
   0x6   :  { %vm46_vm3 = vcmp.eq.s32.totalorder %v26_v9, %v506_v0  ;;  %vm66_vm4 = vcmp.eq.s32.totalorder %v26_v9, %v511_v2  ;;  %vm47_vm5 = vcmp.eq.s32.totalorder %v27_v10, %v506_v0  ;;  %vm67_vm6 = vcmp.eq.s32.totalorder %v27_v10, %v511_v2 }
   0x7   :  { %11 = vsyncpa [#allocation4], 0  ;;  %vm48_vm8 = vcmp.eq.s32.totalorder %v28_v11, %v506_v0  ;;  %vm68_vm9 = vcmp.eq.s32.totalorder %v28_v11, %v511_v2  ;;  %v31_v16 = vadd.s32 48, %v519_v5  ;;  %154 = vperm.xlu1 %445, %v136_v15   ;;  %v471_v17 = vmov 1.0|1.0   ;;  %v246_v19 = vld [vmem:[%s696_s3] sm:$0xff] }
   0x8   :  { %vm82_vm7 = vmor %vm46_vm3, %vm66_vm4  ;;  %144 = vperm.xlu0 %444, %v134_v14   ;;  %vm49_vm12 = vcmp.eq.s32.totalorder %v29_v12, %v506_v0  ;;  %vm69_vm13 = vcmp.eq.s32.totalorder %v29_v12, %v511_v2  ;;  %v32_v18 = vadd.s32 56, %v519_v5  ;;  %vm50_vm15 = vcmp.eq.s32.totalorder %v30_v13, %v506_v0  ;;  %v247_v20 = vld [vmem:[%s696_s3 + $0x8] sm:$0xff]  ;;  %v248_v25 = vld [vmem:[%s696_s3 + $0x10] sm:$0xff]  ;;  %s472_s19 = smov [#allocation3]  }
   0x9   :  { %vm393_vm10 = vmpackc.low %vm82_vm7, %vm81_vm2  ;;  %vm70_vm0 = vcmp.eq.s32.totalorder %v30_v13, %v511_v2  ;;  %v33_v21 = vadd.s32 64, %v519_v5  ;;  %vm51_vm3 = vcmp.eq.s32.totalorder %v31_v16, %v506_v0  ;;  %vm71_vm4 = vcmp.eq.s32.totalorder %v31_v16, %v511_v2  ;;  %v249_v26 = vld [vmem:[%s696_s3 + $0x18] sm:$0xff]  ;;  %v130_v34 = vld [vmem:[%s694_s1 + $0x8] sm:$0xff]  ;;  %s293_s20 = sshll.u32 %s472_s19, 4  ;;  %s294_s20 = int_to_ptr.vmem [resolvable:$true] %s293_s20 }
   0xa   :  { %394 = vmatprep.subr.msk.bf16.mxu0 %vm393_vm10, %v471_v17  ;;  %425 = vmatprep.subr.msk.bf16.mxu1 %vm393_vm10, %v471_v17  ;;  %vm83_vm11 = vmor %vm47_vm5, %vm67_vm6  ;;  %v34_v22 = vadd.s32 72, %v519_v5  ;;  %vm52_vm6 = vcmp.eq.s32.totalorder %v32_v18, %v506_v0  ;;  %vm72_vm7 = vcmp.eq.s32.totalorder %v32_v18, %v511_v2  ;;  %v35_v24 = vadd.s32 80, %v519_v5  ;;  %v132_v35 = vld [vmem:[%s694_s1 + $0x18] sm:$0xff]  ;;  %s446_s21 = scalar_lea.vmem %s294_s20, 16  ;;  %s450_s22 = scalar_lea.vmem %s294_s20, 32 }
   0xb   :  { %396 = vmatpush3.bf16.msk.msra.mxu0 %vm393_vm10, %v471_v17  ;;  %433 = vmatpush3.bf16.msk.msra.mxu1 %vm393_vm10, %v471_v17  ;;  %vm84_vm14 = vmor %vm48_vm8, %vm68_vm9  ;;  %vm53_vm10 = vcmp.eq.s32.totalorder %v33_v21, %v506_v0  ;;  %v36_v27 = vadd.s32 88, %v519_v5  ;;  %v37_v29 = vadd.s32 96, %v519_v5  ;;  %v38_v30 = vadd.s32 104, %v519_v5  ;;  %p447_p0 = scmp.ne.s32.totalorder %s294_s20, %s446_s21  ;;  %p451_p1 = scmp.lt.s32.totalorder %s294_s20, %s294_s20 }
   0xc   :  { %vm397_vm1 = vmpackc.low %vm84_vm14, %vm83_vm11  ;;  %252 = vperm.xlu0 %444, %v246_v19   ;;  %257 = vperm.xlu1 %445, %v247_v20   ;;  %vm73_vm11 = vcmp.eq.s32.totalorder %v33_v21, %v511_v2  ;;  %vm74_vm14 = vcmp.eq.s32.totalorder %v34_v22, %v511_v2  ;;  %v39_v32 = vadd.s32 112, %v519_v5  ;;  %v40_v33 = vadd.s32 120, %v519_v5  ;;  %p452_p2 = scmp.lt.s32.totalorder %s450_s22, %s446_s21 }
   0xd   :  { %398 = vmatprep.subr.msk.bf16.mxu0 %vm397_vm1, %v471_v17  ;;  %426 = vmatprep.subr.msk.bf16.mxu1 %vm397_vm1, %v471_v17  ;;  %vm85_vm2 = vmor %vm49_vm12, %vm69_vm13  ;;  %vm54_vm13 = vcmp.eq.s32.totalorder %v34_v22, %v506_v0  ;;  %v284_v4 = vstv %s697_s4 }
   0xe   :  { %vm86_vm5 = vmor %vm50_vm15, %vm70_vm0  ;;  %p453_p3 = por %p452_p2, %p451_p1 }
   0xf   :  { %400 = vmatpush3.bf16.msk.msra.mxu0 %vm397_vm1, %v471_v17  ;;  %434 = vmatpush3.bf16.msk.msra.mxu1 %vm397_vm1, %v471_v17  ;;  %vm576_vm8 = vmpackc.low %vm86_vm5, %vm85_vm2  ;;  %vm55_vm1 = vcmp.eq.s32.totalorder %v35_v24, %v506_v0  ;;  %vm75_vm2 = vcmp.eq.s32.totalorder %v35_v24, %v511_v2  ;;  %vm76_vm5 = vcmp.eq.s32.totalorder %v36_v27, %v511_v2 }
  0x10   :  { %402 = vmatprep.subr.msk.bf16.mxu0 %vm576_vm8, %v471_v17  ;;  %427 = vmatprep.subr.msk.bf16.mxu1 %vm576_vm8, %v471_v17  ;;  %vm87_vm9 = vmor %vm51_vm3, %vm71_vm4  ;;  %vm56_vm4 = vcmp.eq.s32.totalorder %v36_v27, %v506_v0  ;;  %p454_p4 = pnand %p453_p3, %p447_p0 }
  0x11   :  { %vm88_vm12 = vmor %vm52_vm6, %vm72_vm7  ;;  %262 = vperm.xlu0 %444, %v248_v25   ;;  %267 = vperm.xlu1 %445, %v249_v26  }
  0x12   :  { %vm606_vm15 = vmpackc.low %vm88_vm12, %vm87_vm9  ;;  %vm77_vm9 = vcmp.eq.s32.totalorder %v37_v29, %v511_v2  ;;  %vm78_vm12 = vcmp.eq.s32.totalorder %v38_v30, %v511_v2 }
  0x13   :  { %404 = vmatpush3.bf16.msk.msra.mxu0 %vm576_vm8, %v471_v17  ;;  %435 = vmatpush3.bf16.msk.msra.mxu1 %vm576_vm8, %v471_v17  ;;  %vm89_vm0 = vmor %vm53_vm10, %vm73_vm11  ;;  %vm57_vm8 = vcmp.eq.s32.totalorder %v37_v29, %v506_v0  ;;  %vm58_vm11 = vcmp.eq.s32.totalorder %v38_v30, %v506_v0 }
  0x14   :  { %406 = vmatprep.subr.msk.bf16.mxu0 %vm606_vm15, %v471_v17  ;;  %428 = vmatprep.subr.msk.bf16.mxu1 %vm606_vm15, %v471_v17  ;;  %vm90_vm3 = vmor %vm54_vm13, %vm74_vm14 }
  0x15   :  { %vm628_vm6 = vmpackc.low %vm90_vm3, %vm89_vm0  ;;  %vm80_vm3 = vcmp.eq.s32.totalorder %v40_v33, %v511_v2 }
  0x16   :  { %vm91_vm7 = vmor %vm55_vm1, %vm75_vm2  ;;  %vm79_vm1 = vcmp.eq.s32.totalorder %v39_v32, %v511_v2  ;;  %vm60_vm2 = vcmp.eq.s32.totalorder %v40_v33, %v506_v0 }
  0x17   :  { %408 = vmatpush3.bf16.msk.msra.mxu0 %vm606_vm15, %v471_v17  ;;  %436 = vmatpush3.bf16.msk.msra.mxu1 %vm606_vm15, %v471_v17  ;;  %vm92_vm10 = vmor %vm56_vm4, %vm76_vm5  ;;  %vm59_vm15 = vcmp.eq.s32.totalorder %v39_v32, %v506_v0 }
  0x18   :  { %410 = vmatprep.subr.msk.bf16.mxu0 %vm628_vm6, %v471_v17  ;;  %429 = vmatprep.subr.msk.bf16.mxu1 %vm628_vm6, %v471_v17  ;;  %vm413_vm13 = vmpackc.low %vm92_vm10, %vm91_vm7 }
  0x19   :  { %vm93_vm14 = vmor %vm57_vm8, %vm77_vm9 }
  0x1a   :  { %vm94_vm0 = vmor %vm58_vm11, %vm78_vm12 }
  0x1b   :  { %412 = vmatpush3.bf16.msk.msra.mxu0 %vm628_vm6, %v471_v17  ;;  %437 = vmatpush3.bf16.msk.msra.mxu1 %vm628_vm6, %v471_v17  ;;  %vm417_vm4 = vmpackc.low %vm94_vm0, %vm93_vm14 }
  0x1c   :  { %414 = vmatprep.subr.msk.bf16.mxu0 %vm413_vm13, %v471_v17  ;;  %430 = vmatprep.subr.msk.bf16.mxu1 %vm413_vm13, %v471_v17  ;;  %vm95_vm5 = vmor %vm59_vm15, %vm79_vm1 }
  0x1d   :  { %vm96_vm7 = vmor %vm60_vm2, %vm80_vm3 }
  0x1e   :  { %vm421_vm6 = vmpackc.low %vm96_vm7, %vm95_vm5 }
  0x1f   :  { %416 = vmatpush3.bf16.msk.msra.mxu0 %vm413_vm13, %v471_v17  ;;  %438 = vmatpush3.bf16.msk.msra.mxu1 %vm413_vm13, %v471_v17 }
  0x20   :  { %418 = vmatprep.subr.msk.bf16.mxu0 %vm417_vm4, %v471_v17  ;;  %431 = vmatprep.subr.msk.bf16.mxu1 %vm417_vm4, %v471_v17 }
  0x23   :  { %420 = vmatpush3.bf16.msk.msra.mxu0 %vm417_vm4, %v471_v17  ;;  %439 = vmatpush3.bf16.msk.msra.mxu1 %vm417_vm4, %v471_v17 }
  0x24   :  { %422 = vmatprep.subr.msk.bf16.mxu0 %vm421_vm6, %v471_v17  ;;  %432 = vmatprep.subr.msk.bf16.mxu1 %vm421_vm6, %v471_v17 }
  0x27   :  { %424 = vmatpush3.bf16.msk.msra.mxu0 %vm421_vm6, %v471_v17  ;;  %440 = vmatpush3.bf16.msk.msra.mxu1 %vm421_vm6, %v471_v17 }
  0x2a   :  { %388 = vmatmul.mubr.f32.vlgmr.msra.gmra.mrb[0].mxu0 %v130_v34  ;;  %391 = vmatmul.mubr.f32.vlgmr.msra.gmra.mrb[0].mxu1 %v132_v35 }
  0x82   :  { %v150_v37 = vpop.permute.xlu1 %149 }
  0x83   :  { %v140_v36 = vpop.permute.xlu0 %139 }
  0x86   :  { %v155_v39 = vpop.permute.xlu1 %154 }
  0x87   :  { %v145_v38 = vpop.permute.xlu0 %144 }
  0x8b   :  { %v253_v40 = vpop.permute.xlu0 %252  ;;  %v258_v49 = vpop.permute.xlu1 %257 }
  0x90   :  { %v263_v56 = vpop.permute.xlu0 %262  ;;  %v268_v59 = vpop.permute.xlu1 %267 }
  0xfd   :  { %v389_v41 = vpop.f32.mrb[0].mxu0  ;;  %v392_v42 = vpop.f32.mrb[0].mxu1 }
  0xfe   :  { %v229_v43 = vadd.f32 %v389_v41, %v145_v38  ;;  %v223_v44 = vpop.f32.mrb[1].mxu0  ;;  %v233_v45 = vpop.f32.mrb[1].mxu1  ;;  %v239_v46 = vadd.f32 %v392_v42, %v155_v39 }
  0xff   :  { %v224_v47 = vadd.f32 %v223_v44, %v140_v36  ;;  %v234_v48 = vadd.f32 %v233_v45, %v150_v37 }
 0x100   :  { %v243_v50 = vmax.f32 %v229_v43, 0.0  ;;  %v245_v54 = vmax.f32 %v239_v46, 0.0 }
 0x101   :  { %v242_v51 = vmax.f32 %v224_v47, 0.0  ;;  %v244_v52 = vmax.f32 %v234_v48, 0.0 }
 0x102   :  { %v271_v53 = vmul.f32 %v258_v49, %v243_v50  ;;  %v273_v60 = vmul.f32 %v268_v59, %v245_v54 }
 0x103   :  { %v270_v55 = vmul.f32 %v253_v40, %v242_v51  ;;  %v272_v58 = vmul.f32 %v263_v56, %v244_v52 }
 0x105   :  { %v274_v57 = vadd.f32 %v271_v53, %v270_v55 }
 0x107   :  { %v275_v61 = vadd.f32 %v274_v57, %v272_v58 }
 0x109   :  { %v276_v62 = vadd.f32 %v275_v61, %v273_v60 }
 0x10b   :  { %v277_v63 = vrot.slane %v276_v62, 4 }
 0x10d   :  { %v278_v0 = vadd.f32 %v277_v63, %v276_v62 }
 0x10f   :  { %v279_v1 = vrot.slane %v278_v0, 2 }
 0x111   :  { %v280_v2 = vadd.f32 %v279_v1, %v278_v0 }
 0x113   :  { %v281_v3 = vrot.slane %v280_v2, 1 }
 0x115   :  { %v282_v5 = vadd.f32 %v281_v3, %v280_v2 }
 0x117   :  { %v285_v6 = vadd.f32 %v284_v4, %v282_v5 }
 0x119   :  { %286 = vst [vmem:[#allocation3] sm:$0x1] %v285_v6 }
 0x11a   :  { %457 = shalt.err (!%p454_p4)
}
 0x11b   :  { %s458_s25 = scalar_lea.hbm %s698_s5, 16 }
 0x11c   :  { %p459_p5 = scmp.ne.s32.totalorder %s698_s5, %s458_s25  ;;  %p462_p6 = scmp.lt.u32.totalorder %s458_s25, %s698_s5 }
 0x11e   :  { %p464_p7 = pnand %p462_p6, %p459_p5 }
 0x120   :  { %467 = shalt.err (!%p464_p7)
}
 0x121   :  { %296 = dma.vmem_to_hbm [thread:$0]  %s294_s20, 16, %s698_s5, [#allocation4]  }
 0x122   :  { %468 = dma.done.wait [#allocation4], 16  }
 0x123   :  { %469 = vsyncadd [#allocation4], 4294967280 }
 0x124   :  { %300 = vsyncpa [#allocation4], 1 }

</bundles_post_ra>
